<compile_context>
chip_gen: v6e
topology: v6e:2x2x1
jax: 0.10.0
libtpu: 0.0.40
codegen_flags: <defaults>
</compile_context>

<pallas_src>
import functools

import jax
import jax.numpy as jnp
from jax.experimental import pallas as pl
from jax.experimental.pallas import tpu as pltpu


def _univariate_density_kernel(x_ref, w_ref, vecs_ref, o_ref, *, K, mid_dtype):
    # x_ref   : (1, TN)              batch of scalar latents (lane axis = batch)
    # w_ref   : (max(K-2,1), l, l)   softplus(H) of middle layers (mid_dtype)
    # vecs_ref: (l, 2K+1)            column-packed vector params (f32)
    # o_ref   : (1, TN)
    x = x_ref[...]                                   # (1, TN) f32

    # column layout of vecs:
    #   0          : softplus(H_1)   (l,)
    #   1          : softplus(H_K)   (l,)
    #   2, 3       : b_1, tanh(a_1)
    #   4+2m, 5+2m : b_{2+m}, tanh(a_{2+m})  for middle layers m = 0..K-3
    #   2K         : b_K (scalar, broadcast down the column)
    hs1 = vecs_ref[:, 0:1]                           # (l, 1)
    b1 = vecs_ref[:, 2:3]
    ta1 = vecs_ref[:, 3:4]

    # layer 1: contraction dim is 1 -> pure VPU broadcast (no MXU)
    h = hs1 * x + b1                                 # (l, TN) f32
    h = ta1 * jnp.tanh(h) + h

    # middle layers: (l, l) @ (l, TN) on the MXU.  Operands in mid_dtype
    # (bf16 by default -> ~3x fewer vmatmul pushes than multi-pass f32),
    # accumulation and all elementwise math in f32.
    for m in range(K - 2):
        w = w_ref[m]                                 # (l, l), mid_dtype
        b = vecs_ref[:, 4 + 2 * m:5 + 2 * m]         # (l, 1) f32
        ta = vecs_ref[:, 5 + 2 * m:6 + 2 * m]        # (l, 1) f32
        h = jnp.dot(w, h.astype(mid_dtype),
                    preferred_element_type=jnp.float32) + b
        h = ta * jnp.tanh(h) + h

    # layer K: single output row -> VPU multiply + sublane reduce (skip MXU)
    hsK = vecs_ref[:, 1:2]                           # (l, 1)
    bK = vecs_ref[0:1, 2 * K:2 * K + 1]              # (1, 1)
    z = jnp.sum(hsK * h, axis=0, keepdims=True) + bK  # (1, TN)

    # sigmoid(z) == 0.5 * (tanh(z/2) + 1): keeps the nonlinearity on the EUP
    o_ref[...] = (0.5 * (jnp.tanh(0.5 * z) + 1.0)).astype(o_ref.dtype)


def univariate_density(x, params, *, tile_n=4096, mid_dtype=jnp.bfloat16):
    """x: (N,) or (N, 1) float32 batch of scalar latents.
    params: list of K tuples (H, a, b) exactly as in g_cumul_k:
        H: (d_out, d_in), a: (d_out,), b: (d_out,)."""
    K = len(params)
    assert K >= 2, "UnivariateDensity needs depth K >= 2"
    l = params[0][0].shape[0]
    # Fail loudly on malformed parameter lists (correctness-review item).
    assert params[0][0].shape == (l, 1), "first layer must map 1 -> l"
    assert params[-1][0].shape == (1, l), "last layer must map l -> 1"
    for (H, _a, _b) in params[1:-1]:
        assert H.shape == (l, l), "middle layers must map l -> l"

    x = jnp.asarray(x, jnp.float32).reshape(-1)
    N = x.shape[0]

    # ---- hoist parameter-only transcendentals out of the kernel ----
    H1, a1, b1 = params[0]
    HK, _aK, bK = params[-1]
    cols = [
        jax.nn.softplus(H1.reshape(l).astype(jnp.float32)),     # col 0: softplus(H_1)
        jax.nn.softplus(HK.reshape(l).astype(jnp.float32)),     # col 1: softplus(H_K)
        b1.reshape(l).astype(jnp.float32),                      # col 2: b_1
        jnp.tanh(a1.reshape(l).astype(jnp.float32)),            # col 3: tanh(a_1)
    ]
    w_mid = []
    for (H, a, b) in params[1:-1]:
        # bf16 MXU operand (f32 accumulation happens inside the kernel dot)
        w_mid.append(jax.nn.softplus(H.astype(jnp.float32)).astype(mid_dtype))
        cols.append(b.reshape(l).astype(jnp.float32))
        cols.append(jnp.tanh(a.reshape(l).astype(jnp.float32)))
    cols.append(jnp.full((l,), bK.reshape(-1)[0], jnp.float32))  # col 2K: b_K
    vecs = jnp.stack(cols, axis=1)                               # (l, 2K+1) f32
    w = (jnp.stack(w_mid, axis=0) if w_mid
         else jnp.zeros((1, l, l), mid_dtype))                   # (max(K-2,1), l, l)

    # ---- batch on the lane axis, tiled "parallel" grid over N ----
    tn = min(tile_n, 128 * pl.cdiv(N, 128))          # lane-dense tiles
    if N > 128:
        # ensure >= 2 grid steps so v7x's two TensorCores both get work
        tn = min(tn, 128 * pl.cdiv(N, 256))
    tn = max(tn, 128)
    n_pad = tn * pl.cdiv(N, tn)
    xw = jnp.zeros((1, n_pad), jnp.float32).at[0, :N].set(x)

    # compute-heavy, byte-light: tell XLA so it schedules/overlaps sensibly
    cost = pl.CostEstimate(
        flops=2 * max(K - 2, 0) * l * l * n_pad + 8 * K * l * n_pad,
        transcendentals=(K - 1) * l * n_pad + n_pad,
        bytes_accessed=8 * n_pad + w.size * w.dtype.itemsize + vecs.size * 4,
    )

    kernel = functools.partial(_univariate_density_kernel, K=K,
                               mid_dtype=mid_dtype)
    out = pl.pallas_call(
        kernel,
        out_shape=jax.ShapeDtypeStruct((1, n_pad), jnp.float32),
        grid=(n_pad // tn,),
        in_specs=[
            pl.BlockSpec((1, tn), lambda n: (0, n)),             # x: streamed tiles
            pl.BlockSpec(w.shape, lambda n: (0, 0, 0)),          # weights: resident
            pl.BlockSpec(vecs.shape, lambda n: (0, 0)),          # vectors: resident
        ],
        out_specs=pl.BlockSpec((1, tn), lambda n: (0, n)),
        compiler_params=pltpu.CompilerParams(
            dimension_semantics=("parallel",)),                  # 2 TCs on v7x
        cost_estimate=cost,
    )(xw, w, vecs)

    return out[0, :N].reshape(N, 1)


def univariate_density_ref(x, params, *, bf16_mid=False):
    """Pure-JAX reference mirroring the PyTorch forward for a (N,) scalar batch.
    With bf16_mid=True, the middle-layer matmuls use bf16 operands with f32
    accumulation, matching the kernel's MXU numerics."""
    K = len(params)
    h = jnp.asarray(x, jnp.float32).reshape(-1, 1)
    for i, (H, a, b) in enumerate(params):
        W = jax.nn.softplus(H.astype(jnp.float32))
        if bf16_mid and 0 < i < K - 1:
            h = jnp.dot(h.astype(jnp.bfloat16), W.T.astype(jnp.bfloat16),
                        preferred_element_type=jnp.float32) + b.reshape(1, -1)
        else:
            h = h @ W.T + b.reshape(1, -1)
        if i == K - 1:
            h = jax.nn.sigmoid(h)
        else:
            h = jnp.tanh(a.reshape(1, -1)) * jnp.tanh(h) + h
    return h


if __name__ == "__main__":
    l, K, N = 32, 4, 8   # latent dim, depth, batch of scalar latents

    key = jax.random.PRNGKey(0)
    params = []
    for i in range(1, K + 1):
        d_in = 1 if i == 1 else l
        d_out = 1 if i == K else l
        key, k1, k2, k3 = jax.random.split(key, 4)
        # torch.normal(0, 1, size=(dim_out, dim_in)) analogue
        H = jax.random.normal(k1, (d_out, d_in), jnp.float32)
        a = jax.random.normal(k2, (d_out,), jnp.float32)
        b = jax.random.normal(k3, (d_out,), jnp.float32)
        params.append((H, a, b))

    key, kx = jax.random.split(key)
    # PyTorch forward is called with a 1-D batch of scalar values x of shape (N,)
    x = jax.random.normal(kx, (N,), jnp.float32)

    y = jax.jit(univariate_density)(x, params)
    jax.block_until_ready(y)
    assert y.shape == (N, 1), y.shape

    # Tight check against a reference with identical (bf16-dot / f32-accum)
    # middle-layer numerics.
    y_ref_bf16 = univariate_density_ref(x, params, bf16_mid=True)
    assert jnp.allclose(y, y_ref_bf16, atol=5e-3, rtol=5e-3), (y, y_ref_bf16)

    # Loose semantic sanity check against the pure-f32 PyTorch-equivalent
    # forward (bf16 MXU operands introduce ~1e-3..1e-2 differences pre-sigmoid).
    y_ref_f32 = univariate_density_ref(x, params, bf16_mid=False)
    assert jnp.allclose(y, y_ref_f32, atol=1e-1), (y, y_ref_f32)

    print("KERNEL_OK")
</pallas_src>

<mosaic_0001>
module attributes {stable_mosaic.version = 11 : i64} {
  func.func @_univariate_density_kernel(%arg0: i32, %arg1: memref<1x128xf32, #tpu.memory_space<vmem>>, %arg2: memref<2x32x32xbf16, #tpu.memory_space<vmem>>, %arg3: memref<32x9xf32, #tpu.memory_space<vmem>>, %arg4: memref<1x128xf32, #tpu.memory_space<vmem>>) attributes {dimension_semantics = [#tpu.dimension_semantics<parallel>], iteration_bounds = array<i64: 1>, scalar_prefetch = 0 : i64, scratch_operands = 0 : i64, tpu.core_type = #tpu.core_type<tc>, window_params = [{transform_indices = @transform_0, window_bounds = array<i64: 1, 128>}, {pipeline_mode = #tpu.pipeline_mode<synchronous>, transform_indices = @transform_1, window_bounds = array<i64: 2, 32, 32>}, {pipeline_mode = #tpu.pipeline_mode<synchronous>, transform_indices = @transform_2, window_bounds = array<i64: 32, 9>}, {transform_indices = @transform_3, window_bounds = array<i64: 1, 128>}]} {
    %c0 = arith.constant 0 : index
    %c0_0 = arith.constant 0 : index
    %0 = vector.load %arg1[%c0, %c0_0] : memref<1x128xf32, #tpu.memory_space<vmem>>, vector<1x128xf32>
    %c0_1 = arith.constant 0 : index
    %c0_2 = arith.constant 0 : index
    %1 = vector.load %arg3[%c0_1, %c0_2] : memref<32x9xf32, #tpu.memory_space<vmem>>, vector<32x1xf32>
    %c0_3 = arith.constant 0 : index
    %c2 = arith.constant 2 : index
    %2 = vector.load %arg3[%c0_3, %c2] : memref<32x9xf32, #tpu.memory_space<vmem>>, vector<32x1xf32>
    %c0_4 = arith.constant 0 : index
    %c3 = arith.constant 3 : index
    %3 = vector.load %arg3[%c0_4, %c3] : memref<32x9xf32, #tpu.memory_space<vmem>>, vector<32x1xf32>
    %4 = vector.broadcast %1 : vector<32x1xf32> to vector<32x128xf32>
    %5 = vector.broadcast %0 : vector<1x128xf32> to vector<32x128xf32>
    %6 = arith.mulf %4, %5 : vector<32x128xf32>
    %7 = vector.broadcast %2 : vector<32x1xf32> to vector<32x128xf32>
    %8 = arith.addf %6, %7 : vector<32x128xf32>
    %9 = math.tanh %8 : vector<32x128xf32>
    %10 = vector.broadcast %3 : vector<32x1xf32> to vector<32x128xf32>
    %11 = arith.mulf %10, %9 : vector<32x128xf32>
    %12 = arith.addf %11, %8 : vector<32x128xf32>
    %c0_5 = arith.constant 0 : index
    %c0_6 = arith.constant 0 : index
    %c0_7 = arith.constant 0 : index
    %13 = vector.load %arg2[%c0_5, %c0_6, %c0_7] : memref<2x32x32xbf16, #tpu.memory_space<vmem>>, vector<1x32x32xbf16>
    %14 = vector.shape_cast %13 : vector<1x32x32xbf16> to vector<32x32xbf16>
    %c0_8 = arith.constant 0 : index
    %c4 = arith.constant 4 : index
    %15 = vector.load %arg3[%c0_8, %c4] : memref<32x9xf32, #tpu.memory_space<vmem>>, vector<32x1xf32>
    %c0_9 = arith.constant 0 : index
    %c5 = arith.constant 5 : index
    %16 = vector.load %arg3[%c0_9, %c5] : memref<32x9xf32, #tpu.memory_space<vmem>>, vector<32x1xf32>
    %17 = arith.truncf %12 : vector<32x128xf32> to vector<32x128xbf16>
    %cst = arith.constant dense<0.000000e+00> : vector<32x128xf32>
    %18 = tpu.matmul %14, %17, %cst {dimension_numbers = #tpu.dot_dimension_numbers<[1], [0], [0], [1], [0, 0, 1, 1], [], []>} : vector<32x32xbf16>, vector<32x128xbf16>, vector<32x128xf32> -> vector<32x128xf32>
    %19 = vector.broadcast %15 : vector<32x1xf32> to vector<32x128xf32>
    %20 = arith.addf %18, %19 : vector<32x128xf32>
    %21 = math.tanh %20 : vector<32x128xf32>
    %22 = vector.broadcast %16 : vector<32x1xf32> to vector<32x128xf32>
    %23 = arith.mulf %22, %21 : vector<32x128xf32>
    %24 = arith.addf %23, %20 : vector<32x128xf32>
    %c1 = arith.constant 1 : index
    %c0_10 = arith.constant 0 : index
    %c0_11 = arith.constant 0 : index
    %25 = vector.load %arg2[%c1, %c0_10, %c0_11] : memref<2x32x32xbf16, #tpu.memory_space<vmem>>, vector<1x32x32xbf16>
    %26 = vector.shape_cast %25 : vector<1x32x32xbf16> to vector<32x32xbf16>
    %c0_12 = arith.constant 0 : index
    %c6 = arith.constant 6 : index
    %27 = vector.load %arg3[%c0_12, %c6] : memref<32x9xf32, #tpu.memory_space<vmem>>, vector<32x1xf32>
    %c0_13 = arith.constant 0 : index
    %c7 = arith.constant 7 : index
    %28 = vector.load %arg3[%c0_13, %c7] : memref<32x9xf32, #tpu.memory_space<vmem>>, vector<32x1xf32>
    %29 = arith.truncf %24 : vector<32x128xf32> to vector<32x128xbf16>
    %cst_14 = arith.constant dense<0.000000e+00> : vector<32x128xf32>
    %30 = tpu.matmul %26, %29, %cst_14 {dimension_numbers = #tpu.dot_dimension_numbers<[1], [0], [0], [1], [0, 0, 1, 1], [], []>} : vector<32x32xbf16>, vector<32x128xbf16>, vector<32x128xf32> -> vector<32x128xf32>
    %31 = vector.broadcast %27 : vector<32x1xf32> to vector<32x128xf32>
    %32 = arith.addf %30, %31 : vector<32x128xf32>
    %33 = math.tanh %32 : vector<32x128xf32>
    %34 = vector.broadcast %28 : vector<32x1xf32> to vector<32x128xf32>
    %35 = arith.mulf %34, %33 : vector<32x128xf32>
    %36 = arith.addf %35, %32 : vector<32x128xf32>
    %c0_15 = arith.constant 0 : index
    %c1_16 = arith.constant 1 : index
    %37 = vector.load %arg3[%c0_15, %c1_16] : memref<32x9xf32, #tpu.memory_space<vmem>>, vector<32x1xf32>
    %c0_17 = arith.constant 0 : index
    %c8 = arith.constant 8 : index
    %38 = vector.load %arg3[%c0_17, %c8] : memref<32x9xf32, #tpu.memory_space<vmem>>, vector<1x1xf32>
    %39 = vector.broadcast %37 : vector<32x1xf32> to vector<32x128xf32>
    %40 = arith.mulf %39, %36 : vector<32x128xf32>
    %cst_18 = arith.constant dense<0.000000e+00> : vector<128xf32>
    %41 = vector.multi_reduction <add>, %40, %cst_18 [0] : vector<32x128xf32> to vector<128xf32>
    %42 = vector.shape_cast %41 : vector<128xf32> to vector<1x128xf32>
    %43 = vector.broadcast %38 : vector<1x1xf32> to vector<1x128xf32>
    %44 = arith.addf %42, %43 : vector<1x128xf32>
    %cst_19 = arith.constant 5.000000e-01 : f32
    %45 = vector.broadcast %cst_19 : f32 to vector<1x128xf32>
    %46 = arith.mulf %45, %44 : vector<1x128xf32>
    %47 = math.tanh %46 : vector<1x128xf32>
    %cst_20 = arith.constant 1.000000e+00 : f32
    %48 = vector.broadcast %cst_20 : f32 to vector<1x128xf32>
    %49 = arith.addf %47, %48 : vector<1x128xf32>
    %cst_21 = arith.constant 5.000000e-01 : f32
    %50 = vector.broadcast %cst_21 : f32 to vector<1x128xf32>
    %51 = arith.mulf %50, %49 : vector<1x128xf32>
    %c0_22 = arith.constant 0 : index
    %c0_23 = arith.constant 0 : index
    %52 = vector.load %arg4[%c0_22, %c0_23] : memref<1x128xf32, #tpu.memory_space<vmem>>, vector<1x128xf32>
    tpu.vector_store %arg4[%c0_22, %c0_23], %51 {strides = array<i32>} : memref<1x128xf32, #tpu.memory_space<vmem>>, vector<1x128xf32>,
    return
  }
  func.func @transform_0(%arg0: i32) -> (i32, i32) {
    %c0_i32 = arith.constant 0 : i32
    %c0_i32_0 = arith.constant 0 : i32
    return %c0_i32, %arg0 : i32, i32
  }
  func.func @transform_1(%arg0: i32) -> (i32, i32, i32) {
    %c0_i32 = arith.constant 0 : i32
    %c0_i32_0 = arith.constant 0 : i32
    %c0_i32_1 = arith.constant 0 : i32
    %c0_i32_2 = arith.constant 0 : i32
    return %c0_i32, %c0_i32_0, %c0_i32_1 : i32, i32, i32
  }
  func.func @transform_2(%arg0: i32) -> (i32, i32) {
    %c0_i32 = arith.constant 0 : i32
    %c0_i32_0 = arith.constant 0 : i32
    %c0_i32_1 = arith.constant 0 : i32
    return %c0_i32, %c0_i32_0 : i32, i32
  }
  func.func @transform_3(%arg0: i32) -> (i32, i32) {
    %c0_i32 = arith.constant 0 : i32
    %c0_i32_0 = arith.constant 0 : i32
    return %c0_i32, %arg0 : i32, i32
  }
}

</mosaic_0001>

<bundles_post_ra>
// kernel: ne.6
= control target key start
LH: loop header
LB: loop body
LE: loop exit
PB: predicated region body
PF: predicated region fallthrough
CT: control target
= control target key end

     0   :  { %v16_v2 = vmov 0   ;;  %s41_s0 = inlined_call_operand.vmem [shape: f32[32,1], index: 0, kind: input, shape index: {}, may-alias: {0,1}]   ;;  %s42_s1 = inlined_call_operand.vmem [shape: f32[32,1], index: 1, kind: input, shape index: {}, may-alias: {0,1}]   ;;  %s43_s2 = inlined_call_operand.vmem [shape: pred[32,1], index: 2, kind: output, shape index: {}]  }
   0x1   :  { %v3_v0 = vld [vmem:[%s41_s0] sm:$0x1] }
   0x2   :  { %v4_v1 = vld [vmem:[%s42_s1] sm:$0x1] }
   0x3   :  { %vm7_vm0 = vcmp.ne.f32.partialorder %v3_v0, %v4_v1 }
   0x4   :  { %v8_v3 = vsel %vm7_vm0, 1, %v16_v2 }
   0x5   :  { %v10_v4 = vpack.c.b16 %v16_v2, %v8_v3 }
   0x7   :  { %v11_v5 = vpack.c.b8 %v16_v2, %v10_v4 }
   0x9   :  { %14 = vst [vmem:[%s43_s2] sm:$0x1] %v11_v5 }

// kernel: univariate_density.1
= control target key start
LH: loop header
LB: loop body
LE: loop exit
PB: predicated region body
PF: predicated region fallthrough
CT: control target
= control target key end

     0   :  { %v470_v0 = vmov 2   ;;  %v471_v1 = vmov 0   ;;  %v472_v6 = vmov 3   ;;  %vm130_vm0 = vcmask 261120   ;;  %s576_s2 = inlined_call_operand.vmem [shape: f32[32,9], index: 2, kind: input, shape index: {}]   ;;  %s577_s1 = inlined_call_operand.vmem [shape: bf16[2,32,32], index: 1, kind: input, shape index: {}]   ;;  %s578_s0 = inlined_call_operand.vmem [shape: f32[1,128], index: 0, kind: input, shape index: {}]   ;;  %s579_s3 = inlined_call_operand.vmem [shape: f32[1,128], index: 3, kind: output, shape index: {}]  }
   0x1   :  { %422 = vset.pattern.permute.xlu1 %v470_v0  ;;  %421 = vset.pattern.permute.xlu0 %v471_v1  ;;  %v502_v2 = vld [vmem:[%s576_s2 + $0x10] sm:$0xff]  ;;  %v509_v3 = vld [vmem:[%s576_s2 + $0x18] sm:$0xff]  ;;  %v516_v4 = vld [vmem:[%s576_s2] sm:$0xff]  ;;  %v473_v8 = vmov 4   ;;  %v474_v9 = vmov 5   ;;  %v475_v47 = vmov 6  }
   0x2   :  { %59 = vperm.xlu1 %422, %v502_v2   ;;  %32 = vperm.xlu0 %421, %v502_v2   ;;  %v521_v5 = vld [vmem:[%s576_s2 + $0x8] sm:$0xff]  ;;  %v440_v7 = vld [vmem:[%s577_s1] sm:$0xff]   ;;  %v442_v46 = vld [vmem:[%s577_s1 + $0x10] sm:$0xff]   ;;  %v476_v48 = vmov 7   ;;  %v477_v49 = vmov 1   ;;  %v478_v50 = vmov 8  }
   0x3   :  { %400 = vmatprep.mubr.msk.bf16.mxu0 %vm130_vm0, %v440_v7  ;;  %v375_v10 = vld [vmem:[%s578_s0] ss:$0 sm:$0xff]  ;;  %v441_v45 = vld [vmem:[%s577_s1 + $0x8] sm:$0xff]   ;;  %408 = vmatprep.mubr.msk.bf16.mxu1 %vm130_vm0, %v442_v46 }
   0x4   :  { %v330_v51 = vld [vmem:[%s576_s2] sm:$0x1] }
   0x6   :  { %63 = vperm.xlu1 %422, %v509_v3   ;;  %37 = vperm.xlu0 %421, %v509_v3  }
   0xa   :  { %423 = vset.pattern.permute.xlu1 %v471_v1  ;;  %22 = vperm.xlu0 %421, %v516_v4  }
   0xb   :  { %27 = vperm.xlu1 %423, %v521_v5  }
   0xe   :  { %424 = vset.pattern.permute.xlu0 %v470_v0 }
   0xf   :  { %425 = vset.pattern.permute.xlu1 %v470_v0  ;;  %51 = vperm.xlu0 %424, %v516_v4  }
  0x10   :  { %55 = vperm.xlu1 %425, %v521_v5  }
  0x13   :  { %427 = vset.pattern.permute.xlu0 %v472_v6 }
  0x14   :  { %426 = vset.pattern.permute.xlu1 %v472_v6  ;;  %87 = vperm.xlu0 %427, %v509_v3  }
  0x15   :  { %83 = vperm.xlu1 %426, %v502_v2  }
  0x18   :  { %428 = vset.pattern.permute.xlu0 %v473_v8 }
  0x19   :  { %75 = vperm.xlu1 %426, %v516_v4   ;;  %113 = vperm.xlu0 %428, %v502_v2  }
  0x1d   :  { %79 = vperm.xlu1 %426, %v521_v5   ;;  %109 = vperm.xlu0 %428, %v521_v5  }
  0x21   :  { %429 = vset.pattern.permute.xlu1 %v473_v8  ;;  %431 = vset.pattern.permute.xlu0 %v474_v9 }
  0x22   :  { %117 = vperm.xlu1 %429, %v509_v3   ;;  %203 = vperm.xlu0 %431, %v509_v3  }
  0x26   :  { %105 = vperm.xlu1 %429, %v516_v4   ;;  %432 = vset.pattern.permute.xlu0 %v475_v47 }
  0x27   :  { %222 = vperm.xlu0 %432, %v516_v4  }
  0x2a   :  { %430 = vset.pattern.permute.xlu1 %v474_v9 }
  0x2b   :  { %199 = vperm.xlu1 %430, %v502_v2   ;;  %234 = vperm.xlu0 %432, %v509_v3  }
  0x2f   :  { %191 = vperm.xlu1 %430, %v516_v4   ;;  %435 = vset.pattern.permute.xlu0 %v476_v48 }
  0x30   :  { %311 = vperm.xlu0 %435, %v521_v5  }
  0x33   :  { %195 = vperm.xlu1 %430, %v521_v5  }
  0x34   :  { %436 = vset.pattern.permute.xlu0 %v477_v49 }
  0x35   :  { %332 = vperm.xlu0 %436, %v516_v4  }
  0x37   :  { %433 = vset.pattern.permute.xlu1 %v475_v47 }
  0x38   :  { %226 = vperm.xlu1 %433, %v521_v5  }
  0x39   :  { %344 = vperm.xlu0 %436, %v509_v3  }
  0x3c   :  { %230 = vperm.xlu1 %433, %v502_v2  }
  0x3d   :  { %439 = vset.pattern.permute.xlu0 %v478_v50 }
  0x40   :  { %434 = vset.pattern.permute.xlu1 %v476_v48 }
  0x41   :  { %307 = vperm.xlu1 %434, %v516_v4  }
  0x45   :  { %315 = vperm.xlu1 %434, %v502_v2  }
  0x49   :  { %319 = vperm.xlu1 %434, %v509_v3  }
  0x4d   :  { %437 = vset.pattern.permute.xlu1 %v477_v49 }
  0x4e   :  { %336 = vperm.xlu1 %437, %v521_v5  }
  0x52   :  { %340 = vperm.xlu1 %437, %v502_v2  }
  0x56   :  { %438 = vset.pattern.permute.xlu1 %v478_v50 }
  0x57   :  { %362 = vperm.xlu1 %438, %v330_v51  }
  0x7d   :  { %v60_v11 = vpop.permute.xlu1 %59  ;;  %v33_v12 = vpop.permute.xlu0 %32 }
  0x7e   :  { %v48_v13 = vmul.f32 %v375_v10, %v33_v12 }
  0x80   :  { %v68_v14 = vadd.f32 %v60_v11, %v48_v13 }
  0x81   :  { %v64_v15 = vpop.permute.xlu1 %63  ;;  %v38_v16 = vpop.permute.xlu0 %37 }
  0x82   :  { %444 = vtanh.f32 %v68_v14  ;;  %v49_v17 = vmul.f32 %v375_v10, %v38_v16 }
  0x84   :  { %v69_v18 = vadd.f32 %v64_v15, %v49_v17 }
  0x85   :  { %v23_v19 = vpop.permute.xlu0 %22 }
  0x86   :  { %446 = vtanh.f32 %v69_v18  ;;  %v28_v20 = vpop.permute.xlu1 %27  ;;  %v46_v21 = vmul.f32 %v375_v10, %v23_v19 }
  0x87   :  { %v47_v22 = vmul.f32 %v375_v10, %v28_v20 }
  0x8a   :  { %v52_v23 = vpop.permute.xlu0 %51 }
  0x8b   :  { %v66_v24 = vadd.f32 %v52_v23, %v46_v21  ;;  %v56_v25 = vpop.permute.xlu1 %55 }
  0x8c   :  { %v67_v26 = vadd.f32 %v56_v25, %v47_v22 }
  0x8d   :  { %448 = vtanh.f32 %v66_v24 }
  0x8e   :  { %450 = vtanh.f32 %v67_v26 }
  0x8f   :  { %v445_v27 = vpop.eup %444  ;;  %v88_v29 = vpop.permute.xlu0 %87 }
  0x90   :  { %v84_v28 = vpop.permute.xlu1 %83 }
  0x91   :  { %v92_v30 = vmul.f32 %v445_v27, %v84_v28 }
  0x93   :  { %v447_v31 = vpop.eup %446  ;;  %v96_v34 = vadd.f32 %v92_v30, %v68_v14 }
  0x94   :  { %v93_v32 = vmul.f32 %v447_v31, %v88_v29  ;;  %v76_v33 = vpop.permute.xlu1 %75  ;;  %v114_v53 = vpop.permute.xlu0 %113 }
  0x96   :  { %v97_v35 = vadd.f32 %v93_v32, %v69_v18  ;;  %v443_v18 = vld [vmem:[%s577_s1 + $0x18] sm:$0xff]  }
  0x98   :  { %v103_v36 = vpack.c.bf16 %v97_v35, %v96_v34  ;;  %v80_v40 = vpop.permute.xlu1 %79  ;;  %v110_v61 = vpop.permute.xlu0 %109 }
  0x9a   :  { %v449_v37 = vpop.eup %448  ;;  %396 = vmatprep.subr.bf16.mxu0 %v103_v36 }
  0x9b   :  { %v451_v38 = vpop.eup %450  ;;  %v90_v39 = vmul.f32 %v449_v37, %v76_v33  ;;  %397 = vmatpush3.bf16.msra.mxu0 %v103_v36 }
  0x9c   :  { %v91_v41 = vmul.f32 %v451_v38, %v80_v40 }
  0x9d   :  { %v94_v42 = vadd.f32 %v90_v39, %v66_v24  ;;  %v118_v52 = vpop.permute.xlu1 %117  ;;  %v204_v4 = vpop.permute.xlu0 %203 }
  0x9e   :  { %v95_v43 = vadd.f32 %v91_v41, %v67_v26 }
  0xa0   :  { %v102_v44 = vpack.c.bf16 %v95_v43, %v94_v42 }
  0xa1   :  { %v106_v55 = vpop.permute.xlu1 %105 }
  0xa2   :  { %398 = vmatprep.subr.bf16.mxu0 %v102_v44  ;;  %v223_v21 = vpop.permute.xlu0 %222 }
  0xa3   :  { %399 = vmatpush3.bf16.msra.mxu0 %v102_v44 }
  0xa6   :  { %401 = vmatmul.mubr.msk.bf16.vlgmr.msra.gmra.mxu0 %vm130_vm0, %v441_v45  ;;  %v200_v0 = vpop.permute.xlu1 %199  ;;  %v235_v26 = vpop.permute.xlu0 %234 }
  0xaa   :  { %v192_v2 = vpop.permute.xlu1 %191 }
  0xab   :  { %v312_v34 = vpop.permute.xlu0 %311 }
  0xae   :  { %v196_v10 = vpop.permute.xlu1 %195 }
  0xb0   :  { %v333_v42 = vpop.permute.xlu0 %332 }
  0xb3   :  { %v227_v19 = vpop.permute.xlu1 %226 }
  0xb7   :  { %v231_v20 = vpop.permute.xlu1 %230 }
  0xbc   :  { %v308_v24 = vpop.permute.xlu1 %307 }
  0xc0   :  { %v316_v32 = vpop.permute.xlu1 %315 }
  0xc4   :  { %v320_v33 = vpop.permute.xlu1 %319 }
  0xc9   :  { %v337_v39 = vpop.permute.xlu1 %336 }
  0xcd   :  { %v341_v48 = vpop.permute.xlu1 %340 }
 0x166   :  { %v402_v54 = vpop.f32.mrf.mxu0 }
 0x167   :  { %v180_v56 = vadd.f32 %v402_v54, %v114_v53 }
 0x168   :  { %v171_v57 = vpop.f32.mrf.mxu0 }
 0x169   :  { %452 = vtanh.f32 %v180_v56  ;;  %v172_v58 = vadd.f32 %v171_v57, %v106_v55 }
 0x16a   :  { %v403_v59 = vpop.f32.mrf.mxu0 }
 0x16b   :  { %454 = vtanh.f32 %v172_v58  ;;  %v183_v60 = vadd.f32 %v403_v59, %v118_v52  ;;  %v345_v52 = vpop.permute.xlu0 %344 }
 0x16c   :  { %v174_v62 = vpop.f32.mrf.mxu0 }
 0x16d   :  { %456 = vtanh.f32 %v183_v60  ;;  %v175_v63 = vadd.f32 %v174_v62, %v110_v61 }
 0x16f   :  { %458 = vtanh.f32 %v175_v63 }
 0x176   :  { %v453_v1 = vpop.eup %452 }
 0x177   :  { %v208_v5 = vmul.f32 %v453_v1, %v200_v0 }
 0x178   :  { %v455_v3 = vpop.eup %454 }
 0x179   :  { %v206_v7 = vmul.f32 %v455_v3, %v192_v2  ;;  %v212_v11 = vadd.f32 %v208_v5, %v180_v56 }
 0x17a   :  { %v457_v6 = vpop.eup %456 }
 0x17b   :  { %v209_v8 = vmul.f32 %v457_v6, %v204_v4  ;;  %v210_v14 = vadd.f32 %v206_v7, %v172_v58 }
 0x17c   :  { %v459_v9 = vpop.eup %458 }
 0x17d   :  { %v207_v12 = vmul.f32 %v459_v9, %v196_v10  ;;  %v213_v13 = vadd.f32 %v209_v8, %v183_v60 }
 0x17f   :  { %v211_v15 = vadd.f32 %v207_v12, %v175_v63  ;;  %v220_v16 = vpack.c.bf16 %v213_v13, %v212_v11  ;;  %v363_v63 = vpop.permute.xlu1 %362 }
 0x181   :  { %404 = vmatprep.subr.bf16.mxu1 %v220_v16  ;;  %v219_v17 = vpack.c.bf16 %v211_v15, %v210_v14 }
 0x182   :  { %405 = vmatpush3.bf16.msra.mxu1 %v220_v16 }
 0x183   :  { %406 = vmatprep.subr.bf16.mxu1 %v219_v17 }
 0x186   :  { %407 = vmatpush3.bf16.msra.mxu1 %v219_v17 }
 0x189   :  { %409 = vmatmul.mubr.msk.bf16.vlgmr.msra.gmra.mxu1 %vm130_vm0, %v443_v18 }
 0x249   :  { %v410_v22 = vpop.f32.mrf.mxu1 }
 0x24a   :  { %v296_v23 = vadd.f32 %v410_v22, %v231_v20 }
 0x24b   :  { %v287_v25 = vpop.f32.mrf.mxu1 }
 0x24c   :  { %v288_v27 = vadd.f32 %v287_v25, %v223_v21  ;;  %460 = vtanh.f32 %v296_v23 }
 0x24d   :  { %v411_v28 = vpop.f32.mrf.mxu1 }
 0x24e   :  { %462 = vtanh.f32 %v288_v27  ;;  %v299_v29 = vadd.f32 %v411_v28, %v235_v26 }
 0x24f   :  { %v290_v30 = vpop.f32.mrf.mxu1 }
 0x250   :  { %464 = vtanh.f32 %v299_v29  ;;  %v291_v31 = vadd.f32 %v290_v30, %v227_v19 }
 0x252   :  { %466 = vtanh.f32 %v291_v31 }
 0x259   :  { %v461_v35 = vpop.eup %460 }
 0x25a   :  { %v324_v40 = vmul.f32 %v461_v35, %v316_v32 }
 0x25b   :  { %v463_v36 = vpop.eup %462 }
 0x25c   :  { %v322_v37 = vmul.f32 %v463_v36, %v308_v24  ;;  %v328_v47 = vadd.f32 %v324_v40, %v296_v23 }
 0x25d   :  { %v465_v38 = vpop.eup %464 }
 0x25e   :  { %v325_v43 = vmul.f32 %v465_v38, %v320_v33  ;;  %v326_v45 = vadd.f32 %v322_v37, %v288_v27  ;;  %v349_v53 = vmul.f32 %v341_v48, %v328_v47 }
 0x25f   :  { %v467_v41 = vpop.eup %466 }
 0x260   :  { %v323_v44 = vmul.f32 %v467_v41, %v312_v34  ;;  %v347_v49 = vmul.f32 %v333_v42, %v326_v45  ;;  %v329_v51 = vadd.f32 %v325_v43, %v299_v29 }
 0x262   :  { %v327_v46 = vadd.f32 %v323_v44, %v291_v31  ;;  %v350_v55 = vmul.f32 %v345_v52, %v329_v51 }
 0x264   :  { %v348_v50 = vmul.f32 %v337_v39, %v327_v46 }
 0x266   :  { %v351_v54 = vadd.f32 %v348_v50, %v347_v49 }
 0x268   :  { %v352_v56 = vadd.f32 %v351_v54, %v349_v53 }
 0x26a   :  { %v353_v57 = vadd.f32 %v352_v56, %v350_v55 }
 0x26c   :  { %v354_v58 = vrot.slane %v353_v57, 4 }
 0x26e   :  { %v355_v59 = vadd.f32 %v354_v58, %v353_v57 }
 0x270   :  { %v356_v60 = vrot.slane %v355_v59, 2 }
 0x272   :  { %v357_v61 = vadd.f32 %v356_v60, %v355_v59 }
 0x274   :  { %v358_v62 = vrot.slane %v357_v61, 1 }
 0x276   :  { %v359_v0 = vadd.f32 %v358_v62, %v357_v61 }
 0x278   :  { %v365_v1 = vadd.f32 %v363_v63, %v359_v0 }
 0x27a   :  { %v366_v2 = vmul.f32 0.5, %v365_v1 }
 0x27c   :  { %468 = vtanh.f32 %v366_v2 }
 0x289   :  { %v469_v3 = vpop.eup %468 }
 0x28a   :  { %v368_v4 = vadd.f32 1.0, %v469_v3 }
 0x28c   :  { %v369_v5 = vmul.f32 0.5, %v368_v4 }
 0x28e   :  { %370 = vst [vmem:[%s579_s3] sm:$0x1] %v369_v5 }

</bundles_post_ra>
